<compile_context>
chip_gen: v5e
topology: v5e:2x2
jax: 0.10.0
libtpu: 0.0.40
codegen_flags: <defaults>
</compile_context>

<pallas_src>
import functools

import jax
import jax.numpy as jnp
from jax.experimental import pallas as pl
from jax.experimental.pallas import tpu as pltpu

IN_FEATURES = 14


def _round_up(n, m):
    return ((n + m - 1) // m) * m


def _mlp_kernel(x_ref, w0_ref, b0_ref, wh_ref, bh_ref, wf_ref, bf_ref, o_ref,
                *, num_layers):
    # First linear: bf16 x bf16 on the MXU, f32 accumulate (K=14 is tiny and
    # Mosaic masks the lane/sublane padding). No ReLU after this layer (matches
    # the PyTorch module: the first ReLU follows the first hidden Linear).
    h = jnp.dot(x_ref[...].astype(jnp.bfloat16), w0_ref[...],
                preferred_element_type=jnp.float32)
    h = h.astype(jnp.bfloat16) + b0_ref[...]          # bf16 activation carry

    # Hidden blocks: Linear -> ReLU (Dropout is identity at inference).
    # num_layers is small and static, so the Python loop fully unrolls.
    for l in range(num_layers):
        h = jnp.dot(h, wh_ref[l], preferred_element_type=jnp.float32)
        h = h.astype(jnp.bfloat16) + bh_ref[l]        # bias-add in bf16
        h = jnp.maximum(h, 0.0)                       # ReLU in bf16

    # Final linear straight into the single real output column (no 128-pad).
    out = jnp.dot(h, wf_ref[...], preferred_element_type=jnp.float32) + bf_ref[...]
    o_ref[...] = out.astype(o_ref.dtype)


def prepare_params(params, *, num_layers, hidden_size):
    """One-time parameter prep (hoisted out of the per-call forward):
    bf16 weights/biases for the bf16 MXU + bf16 activation carry; final bias f32."""
    w0, b0, wh, bh, wf, bf = params
    H = hidden_size
    L = num_layers
    return (
        w0.astype(jnp.bfloat16),                       # (14, H)
        b0.reshape(1, H).astype(jnp.bfloat16),         # (1, H)
        wh.astype(jnp.bfloat16),                       # (L, H, H)
        bh.reshape(L, 1, H).astype(jnp.bfloat16),      # (L, 1, H)
        wf.astype(jnp.bfloat16),                       # (H, 1)
        bf.reshape(1, 1).astype(jnp.float32),          # (1, 1)
    )


def _choose_tile_m(batch, tile_m):
    """Clamp tile_m to a multiple of 8 covering the batch; for large batches keep
    at least 2 grid steps so v7x's 2 TensorCores both get work."""
    tile_m = max(8, min(tile_m, _round_up(batch, 8)))
    if batch >= 512:
        tile_m = min(tile_m, _round_up(pl.cdiv(batch, 2), 8))
    return tile_m


def optiver_net_forward(x, prepared, *, num_layers, hidden_size, tile_m=512):
    """x: (B, 14) float32 -> (B, 1) float32. Batch may be ragged w.r.t. tile_m."""
    w0, b0, wh, bh, wf, bf = prepared
    B = x.shape[0]
    H = hidden_size
    L = num_layers

    tile_m = _choose_tile_m(B, tile_m)
    grid_m = pl.cdiv(B, tile_m)

    kernel = functools.partial(_mlp_kernel, num_layers=L)

    # Advisory cost + VMEM residency estimate (weights single-buffered, I/O double).
    flops = 2 * B * (IN_FEATURES * H + L * H * H + H)
    weight_bytes = sum(int(p.size) * p.dtype.itemsize for p in prepared)
    bytes_accessed = int(x.size) * 4 + weight_bytes + B * 4
    cost = pl.CostEstimate(flops=flops, transcendentals=0,
                           bytes_accessed=bytes_accessed)

    io_bytes = 2 * tile_m * IN_FEATURES * 4 + 2 * tile_m * 4
    act_bytes = 2 * tile_m * H * (4 + 2)          # f32 accumulator + bf16 carry, slack
    vmem_need = weight_bytes + io_bytes + act_bytes
    vmem_limit = int(min(48 * 1024 * 1024, max(16 * 1024 * 1024, 2 * vmem_need)))

    const = dict(pipeline_mode=pl.Buffered(1))    # single-buffer constant operands

    return pl.pallas_call(
        kernel,
        out_shape=jax.ShapeDtypeStruct((B, 1), jnp.float32),
        grid=(grid_m,),
        in_specs=[
            pl.BlockSpec((tile_m, IN_FEATURES), lambda i: (i, 0)),        # x
            pl.BlockSpec((IN_FEATURES, H), lambda i: (0, 0), **const),    # w0 (bf16)
            pl.BlockSpec((1, H), lambda i: (0, 0), **const),              # b0 (bf16)
            pl.BlockSpec((L, H, H), lambda i: (0, 0, 0), **const),        # hidden W (bf16)
            pl.BlockSpec((L, 1, H), lambda i: (0, 0, 0), **const),        # hidden b (bf16)
            pl.BlockSpec((H, 1), lambda i: (0, 0), **const),              # wf (bf16)
            pl.BlockSpec((1, 1), lambda i: (0, 0), **const),              # bf (f32)
        ],
        out_specs=pl.BlockSpec((tile_m, 1), lambda i: (i, 0)),            # lean (B,1) output
        compiler_params=pltpu.CompilerParams(
            dimension_semantics=("parallel",),
            vmem_limit_bytes=vmem_limit),
        cost_estimate=cost,
    )(x, w0, b0, wh, bh, wf, bf)


def init_params(key, *, num_layers, hidden_size):
    """Deterministic PyTorch-style uniform(-1/sqrt(fan_in), 1/sqrt(fan_in)) init."""
    H = hidden_size
    ks = jax.random.split(key, 6)

    def u(k, shape, fan_in):
        bound = 1.0 / jnp.sqrt(float(fan_in))
        return jax.random.uniform(k, shape, jnp.float32, -bound, bound)

    w0 = u(ks[0], (IN_FEATURES, H), IN_FEATURES)     # Linear(14, H), stored (in, out)
    b0 = u(ks[1], (H,), IN_FEATURES)
    wh = u(ks[2], (num_layers, H, H), H)             # stacked Linear(H, H)
    bh = u(ks[3], (num_layers, H), H)
    wf = u(ks[4], (H, 1), H)                         # Linear(H, 1)
    bf = u(ks[5], (1,), H)
    return (w0, b0, wh, bh, wf, bf)


def reference_forward(x, prepared, *, num_layers):
    """Plain-JAX reference mirroring the kernel's bf16 rounding (like-for-like)."""
    w0, b0, wh, bh, wf, bf = prepared
    h = jnp.dot(x.astype(jnp.bfloat16), w0, preferred_element_type=jnp.float32)
    h = h.astype(jnp.bfloat16) + b0
    for l in range(num_layers):
        h = jnp.dot(h, wh[l], preferred_element_type=jnp.float32)
        h = h.astype(jnp.bfloat16) + bh[l]
        h = jnp.maximum(h, 0.0)
    return jnp.dot(h, wf, preferred_element_type=jnp.float32) + bf


if __name__ == "__main__":
    NUM_LAYERS = 3      # module default is 10; small config for the smoke test
    HIDDEN = 128        # module default is 256; one full lane width is enough here
    BATCH = 100         # not a multiple of tile_m -> exercises the ragged tail tile

    key = jax.random.PRNGKey(0)
    kx, kp = jax.random.split(key)
    x = jax.random.normal(kx, (BATCH, IN_FEATURES), jnp.float32)
    raw = init_params(kp, num_layers=NUM_LAYERS, hidden_size=HIDDEN)
    params = prepare_params(raw, num_layers=NUM_LAYERS, hidden_size=HIDDEN)

    # tile_m=64 -> grid of 2 tiles, second one partial (exercises masked writeback).
    out = optiver_net_forward(x, params, num_layers=NUM_LAYERS,
                              hidden_size=HIDDEN, tile_m=64)
    out = jax.block_until_ready(out)

    ref = reference_forward(x, params, num_layers=NUM_LAYERS)
    assert out.shape == (BATCH, 1), out.shape
    assert jnp.allclose(out, ref, atol=5e-2, rtol=5e-2), "mismatch vs reference"

    print("KERNEL_OK")
</pallas_src>

<mosaic_0001>
module attributes {stable_mosaic.version = 11 : i64} {
  func.func @_mlp_kernel(%arg0: i32, %arg1: memref<64x14xf32, #tpu.memory_space<vmem>>, %arg2: memref<14x128xbf16, #tpu.memory_space<vmem>>, %arg3: memref<1x128xbf16, #tpu.memory_space<vmem>>, %arg4: memref<3x128x128xbf16, #tpu.memory_space<vmem>>, %arg5: memref<3x1x128xbf16, #tpu.memory_space<vmem>>, %arg6: memref<128x1xbf16, #tpu.memory_space<vmem>>, %arg7: memref<1x1xf32, #tpu.memory_space<vmem>>, %arg8: memref<64x1xf32, #tpu.memory_space<vmem>>) attributes {dimension_semantics = [#tpu.dimension_semantics<parallel>], iteration_bounds = array<i64: 2>, scalar_prefetch = 0 : i64, scratch_operands = 0 : i64, tpu.core_type = #tpu.core_type<tc>, window_params = [{transform_indices = @transform_0, window_bounds = array<i64: 64, 14>}, {pipeline_mode = #tpu.pipeline_mode<synchronous>, transform_indices = @transform_1, window_bounds = array<i64: 14, 128>}, {pipeline_mode = #tpu.pipeline_mode<synchronous>, transform_indices = @transform_2, window_bounds = array<i64: 1, 128>}, {pipeline_mode = #tpu.pipeline_mode<synchronous>, transform_indices = @transform_3, window_bounds = array<i64: 3, 128, 128>}, {pipeline_mode = #tpu.pipeline_mode<synchronous>, transform_indices = @transform_4, window_bounds = array<i64: 3, 1, 128>}, {pipeline_mode = #tpu.pipeline_mode<synchronous>, transform_indices = @transform_5, window_bounds = array<i64: 128, 1>}, {pipeline_mode = #tpu.pipeline_mode<synchronous>, transform_indices = @transform_6, window_bounds = array<i64: 1, 1>}, {transform_indices = @transform_7, window_bounds = array<i64: 64, 1>}]} {
    %c0 = arith.constant 0 : index
    %c0_0 = arith.constant 0 : index
    %0 = vector.load %arg1[%c0, %c0_0] : memref<64x14xf32, #tpu.memory_space<vmem>>, vector<64x14xf32>
    %1 = arith.truncf %0 : vector<64x14xf32> to vector<64x14xbf16>
    %c0_1 = arith.constant 0 : index
    %c0_2 = arith.constant 0 : index
    %2 = vector.load %arg2[%c0_1, %c0_2] : memref<14x128xbf16, #tpu.memory_space<vmem>>, vector<14x128xbf16>
    %cst = arith.constant dense<0.000000e+00> : vector<64x128xf32>
    %3 = tpu.matmul %1, %2, %cst {dimension_numbers = #tpu.dot_dimension_numbers<[1], [0], [0], [1], [0, 0, 1, 1], [], []>} : vector<64x14xbf16>, vector<14x128xbf16>, vector<64x128xf32> -> vector<64x128xf32>
    %4 = arith.truncf %3 : vector<64x128xf32> to vector<64x128xbf16>
    %c0_3 = arith.constant 0 : index
    %c0_4 = arith.constant 0 : index
    %5 = vector.load %arg3[%c0_3, %c0_4] : memref<1x128xbf16, #tpu.memory_space<vmem>>, vector<1x128xbf16>
    %6 = vector.broadcast %5 : vector<1x128xbf16> to vector<64x128xbf16>
    %7 = arith.addf %4, %6 : vector<64x128xbf16>
    %c0_5 = arith.constant 0 : index
    %c0_6 = arith.constant 0 : index
    %c0_7 = arith.constant 0 : index
    %8 = vector.load %arg4[%c0_5, %c0_6, %c0_7] : memref<3x128x128xbf16, #tpu.memory_space<vmem>>, vector<1x128x128xbf16>
    %9 = vector.shape_cast %8 : vector<1x128x128xbf16> to vector<128x128xbf16>
    %cst_8 = arith.constant dense<0.000000e+00> : vector<64x128xf32>
    %10 = tpu.matmul %7, %9, %cst_8 {dimension_numbers = #tpu.dot_dimension_numbers<[1], [0], [0], [1], [0, 0, 1, 1], [], []>} : vector<64x128xbf16>, vector<128x128xbf16>, vector<64x128xf32> -> vector<64x128xf32>
    %11 = arith.truncf %10 : vector<64x128xf32> to vector<64x128xbf16>
    %c0_9 = arith.constant 0 : index
    %c0_10 = arith.constant 0 : index
    %c0_11 = arith.constant 0 : index
    %12 = vector.load %arg5[%c0_9, %c0_10, %c0_11] : memref<3x1x128xbf16, #tpu.memory_space<vmem>>, vector<1x1x128xbf16>
    %13 = vector.shape_cast %12 : vector<1x1x128xbf16> to vector<1x128xbf16>
    %14 = vector.broadcast %13 : vector<1x128xbf16> to vector<64x128xbf16>
    %15 = arith.addf %11, %14 : vector<64x128xbf16>
    %cst_12 = arith.constant 0.000000e+00 : bf16
    %16 = vector.broadcast %cst_12 : bf16 to vector<64x128xbf16>
    %17 = arith.maximumf %15, %16 : vector<64x128xbf16>
    %c1 = arith.constant 1 : index
    %c0_13 = arith.constant 0 : index
    %c0_14 = arith.constant 0 : index
    %18 = vector.load %arg4[%c1, %c0_13, %c0_14] : memref<3x128x128xbf16, #tpu.memory_space<vmem>>, vector<1x128x128xbf16>
    %19 = vector.shape_cast %18 : vector<1x128x128xbf16> to vector<128x128xbf16>
    %cst_15 = arith.constant dense<0.000000e+00> : vector<64x128xf32>
    %20 = tpu.matmul %17, %19, %cst_15 {dimension_numbers = #tpu.dot_dimension_numbers<[1], [0], [0], [1], [0, 0, 1, 1], [], []>} : vector<64x128xbf16>, vector<128x128xbf16>, vector<64x128xf32> -> vector<64x128xf32>
    %21 = arith.truncf %20 : vector<64x128xf32> to vector<64x128xbf16>
    %c1_16 = arith.constant 1 : index
    %c0_17 = arith.constant 0 : index
    %c0_18 = arith.constant 0 : index
    %22 = vector.load %arg5[%c1_16, %c0_17, %c0_18] : memref<3x1x128xbf16, #tpu.memory_space<vmem>>, vector<1x1x128xbf16>
    %23 = vector.shape_cast %22 : vector<1x1x128xbf16> to vector<1x128xbf16>
    %24 = vector.broadcast %23 : vector<1x128xbf16> to vector<64x128xbf16>
    %25 = arith.addf %21, %24 : vector<64x128xbf16>
    %cst_19 = arith.constant 0.000000e+00 : bf16
    %26 = vector.broadcast %cst_19 : bf16 to vector<64x128xbf16>
    %27 = arith.maximumf %25, %26 : vector<64x128xbf16>
    %c2 = arith.constant 2 : index
    %c0_20 = arith.constant 0 : index
    %c0_21 = arith.constant 0 : index
    %28 = vector.load %arg4[%c2, %c0_20, %c0_21] : memref<3x128x128xbf16, #tpu.memory_space<vmem>>, vector<1x128x128xbf16>
    %29 = vector.shape_cast %28 : vector<1x128x128xbf16> to vector<128x128xbf16>
    %cst_22 = arith.constant dense<0.000000e+00> : vector<64x128xf32>
    %30 = tpu.matmul %27, %29, %cst_22 {dimension_numbers = #tpu.dot_dimension_numbers<[1], [0], [0], [1], [0, 0, 1, 1], [], []>} : vector<64x128xbf16>, vector<128x128xbf16>, vector<64x128xf32> -> vector<64x128xf32>
    %31 = arith.truncf %30 : vector<64x128xf32> to vector<64x128xbf16>
    %c2_23 = arith.constant 2 : index
    %c0_24 = arith.constant 0 : index
    %c0_25 = arith.constant 0 : index
    %32 = vector.load %arg5[%c2_23, %c0_24, %c0_25] : memref<3x1x128xbf16, #tpu.memory_space<vmem>>, vector<1x1x128xbf16>
    %33 = vector.shape_cast %32 : vector<1x1x128xbf16> to vector<1x128xbf16>
    %34 = vector.broadcast %33 : vector<1x128xbf16> to vector<64x128xbf16>
    %35 = arith.addf %31, %34 : vector<64x128xbf16>
    %cst_26 = arith.constant 0.000000e+00 : bf16
    %36 = vector.broadcast %cst_26 : bf16 to vector<64x128xbf16>
    %37 = arith.maximumf %35, %36 : vector<64x128xbf16>
    %c0_27 = arith.constant 0 : index
    %c0_28 = arith.constant 0 : index
    %38 = vector.load %arg6[%c0_27, %c0_28] : memref<128x1xbf16, #tpu.memory_space<vmem>>, vector<128x1xbf16>
    %cst_29 = arith.constant dense<0.000000e+00> : vector<64x1xf32>
    %39 = tpu.matmul %37, %38, %cst_29 {dimension_numbers = #tpu.dot_dimension_numbers<[1], [0], [0], [1], [0, 0, 1, 1], [], []>} : vector<64x128xbf16>, vector<128x1xbf16>, vector<64x1xf32> -> vector<64x1xf32>
    %c0_30 = arith.constant 0 : index
    %c0_31 = arith.constant 0 : index
    %40 = vector.load %arg7[%c0_30, %c0_31] : memref<1x1xf32, #tpu.memory_space<vmem>>, vector<1x1xf32>
    %41 = vector.broadcast %40 : vector<1x1xf32> to vector<64x1xf32>
    %42 = arith.addf %39, %41 : vector<64x1xf32>
    %c0_32 = arith.constant 0 : index
    %c0_33 = arith.constant 0 : index
    %43 = vector.load %arg8[%c0_32, %c0_33] : memref<64x1xf32, #tpu.memory_space<vmem>>, vector<64x1xf32>
    tpu.vector_store %arg8[%c0_32, %c0_33], %42 {strides = array<i32>} : memref<64x1xf32, #tpu.memory_space<vmem>>, vector<64x1xf32>,
    return
  }
  func.func @transform_0(%arg0: i32) -> (i32, i32) {
    %c0_i32 = arith.constant 0 : i32
    %c0_i32_0 = arith.constant 0 : i32
    return %arg0, %c0_i32 : i32, i32
  }
  func.func @transform_1(%arg0: i32) -> (i32, i32) {
    %c0_i32 = arith.constant 0 : i32
    %c0_i32_0 = arith.constant 0 : i32
    %c0_i32_1 = arith.constant 0 : i32
    return %c0_i32, %c0_i32_0 : i32, i32
  }
  func.func @transform_2(%arg0: i32) -> (i32, i32) {
    %c0_i32 = arith.constant 0 : i32
    %c0_i32_0 = arith.constant 0 : i32
    %c0_i32_1 = arith.constant 0 : i32
    return %c0_i32, %c0_i32_0 : i32, i32
  }
  func.func @transform_3(%arg0: i32) -> (i32, i32, i32) {
    %c0_i32 = arith.constant 0 : i32
    %c0_i32_0 = arith.constant 0 : i32
    %c0_i32_1 = arith.constant 0 : i32
    %c0_i32_2 = arith.constant 0 : i32
    return %c0_i32, %c0_i32_0, %c0_i32_1 : i32, i32, i32
  }
  func.func @transform_4(%arg0: i32) -> (i32, i32, i32) {
    %c0_i32 = arith.constant 0 : i32
    %c0_i32_0 = arith.constant 0 : i32
    %c0_i32_1 = arith.constant 0 : i32
    %c0_i32_2 = arith.constant 0 : i32
    return %c0_i32, %c0_i32_0, %c0_i32_1 : i32, i32, i32
  }
  func.func @transform_5(%arg0: i32) -> (i32, i32) {
    %c0_i32 = arith.constant 0 : i32
    %c0_i32_0 = arith.constant 0 : i32
    %c0_i32_1 = arith.constant 0 : i32
    return %c0_i32, %c0_i32_0 : i32, i32
  }
  func.func @transform_6(%arg0: i32) -> (i32, i32) {
    %c0_i32 = arith.constant 0 : i32
    %c0_i32_0 = arith.constant 0 : i32
    %c0_i32_1 = arith.constant 0 : i32
    return %c0_i32, %c0_i32_0 : i32, i32
  }
  func.func @transform_7(%arg0: i32) -> (i32, i32) {
    %c0_i32 = arith.constant 0 : i32
    %c0_i32_0 = arith.constant 0 : i32
    return %arg0, %c0_i32 : i32, i32
  }
}

</mosaic_0001>

<bundles_post_ra>
// kernel: tpu_custom_call.1
= control target key start
LH: loop header
LB: loop body
LE: loop exit
PB: predicated region body
PF: predicated region fallthrough
CT: control target
= control target key end

     0   :  { %s2064_s0 = inlined_call_operand.vmem [shape: f32[100,14], index: 0, kind: input, shape index: {}]   ;;  %s2065_s1 = inlined_call_operand.hbm [shape: bf16[14,128], index: 1, kind: input, shape index: {}]   ;;  %s2066_s2 = inlined_call_operand.hbm [shape: bf16[1,128], index: 2, kind: input, shape index: {}]   ;;  %s2067_s3 = inlined_call_operand.vmem [shape: bf16[3,128,128], index: 3, kind: input, shape index: {}]   ;;  %s2068_s4 = inlined_call_operand.vmem [shape: bf16[3,1,128], index: 4, kind: input, shape index: {}]   ;;  %s2069_s5 = inlined_call_operand.vmem [shape: bf16[128,1], index: 5, kind: input, shape index: {}]   ;;  %s2070_s6 = inlined_call_operand.<no memory space> [shape: f32[1,1], index: 6, kind: input, shape index: {}]   ;;  %s2071_s7 = inlined_call_operand.vmem [shape: f32[100,1], index: 7, kind: output, shape index: {}]  }
   0x1   :  { %v12_v0 = vstv %s2070_s6 }
   0x2   :  { %13 = vst [vmem:[#allocation2] sm:$0x1] %v12_v0 }
   0x3   :  { %14 = vsyncpa [#allocation4], 0 }
   0x4   :  { %15 = vsyncpa [#allocation6], 0  ;;  %s1813_s26 = smov 0   ;;  %s1815_s27 = smov 0  }
   0x5   :  { %s1817_s28 = smov 0  }
   0x6 LB: > { %s1826_s6 = sadd.s32 4294967295, %s1732_s28   ;;  %s1828_s29 = sadd.s32 1, %s1732_s28   ;;  %s1732_s28 = sphi %s1817_s28, %s2080_s28   ;;  %s1728_s27 = sphi %s1815_s27, %s2079_s27   ;;  %s1724_s26 = sphi %s1813_s26, %s2078_s26  }
   0x7   : > { %s177_s30 = ssub.s32 %s1732_s28, %s1828_s29  ;;  %s180_s8 = sadd.s32 1, %s1728_s27 }
   0x8   : > { %p178_p0 = scmp.eq.s32.totalorder %s177_s30, 0  ;;  %p190_p1 = scmp.ne.s32.totalorder %s1728_s27, %s1724_s26 }
   0x9   : > { %p191_p2 = scmp.eq.s32.totalorder %s1826_s6, 1  ;;  %p1264_p3 = scmp.ge.s32.totalorder %s1732_s28, 1 }
   0xa   : > { %s1836_s9 = scalar_select %p178_p0, %s1728_s27, %s180_s8  }
   0xb   : > { %p1838_p4 = por %p191_p2, %p190_p1  ;;  %p204_p5 = scmp.lt.s32.totalorder %s1732_s28, 3 }
   0xc   : > { %p1513_p6 = scmp.eq.s32.totalorder %s1826_s6, 0  ;;  %s215_s14 = sshll.u32 %s2065_s1, 4  ;;  %s216_s14 = int_to_ptr.hbm [resolvable:$true] %s215_s14 }
   0xd   : > { %p1843_p7 = pnand %p1264_p3, %p204_p5  ;;  %s1766_s15 = smov [#allocation3]  }
   0xe   : > { %s217_s16 = sshll.u32 %s1766_s15, 4  ;;  %s230_s19 = sshll.u32 %s2066_s2, 4  ;;  %s218_s16 = int_to_ptr.vmem [resolvable:$true] %s217_s16  ;;  %s231_s19 = int_to_ptr.hbm [resolvable:$true] %s230_s19 }
   0xf   : > { %p1506_p8 = pneg %p1843_p7  ;;  %s1767_s20 = smov 64  }
  0x10   : > { %s1768_s21 = smov 4   ;;  %s1769_s22 = smov [#allocation5]  }
  0x11   : > { %p1507_p9 = pnand %p1513_p6, %p1506_p8  ;;  %s232_s23 = sshll.u32 %s1769_s22, 4  ;;  %s233_s23 = int_to_ptr.vmem [resolvable:$true] %s232_s23 }
  0x12   : > { %274 = sbr.rel (%p1843_p7) target bundleno = 849 (0x351), region = 48 }
  0x13   : > { %1509 = dma.hbm_to_vmem [thread:$0]  (!%p1507_p9), %s216_s14, 128, %s218_s16, [#allocation4], %s1767_s20, %s1767_s20, %s1768_s21  }
  0x14   : > { %1512 = dma.hbm_to_vmem [thread:$0]  (!%p1507_p9), %s231_s19, 16, %s233_s23, [#allocation6]  }
  0x17   : > { %1715 = dma.done.wait (%p1513_p6), [#allocation4], 128  }
  0x18   : > { %1717 = vsyncadd (%p1513_p6), [#allocation4], 4294967168 }
  0x19   : > { %1719 = dma.done.wait (%p1513_p6), [#allocation6], 16  }
  0x1a   : > { %1721 = vsyncadd (%p1513_p6), [#allocation6], 4294967280  ;;  %s1868_s24 = sshll.u32 %s1826_s6, 3  ;;  %v1276_v1 = vld [vmem:[#allocation3] sm:$0xf]  ;;  %vm367_vm0 = vcmask 1046528  }
  0x1b   : > { %p320_p10 = scmp.lt.s32.totalorder %s1868_s24, 12  ;;  %v1461_v2 = vld [vmem:[#allocation3] sm:$0x70]  ;;  %v1469_v11 = vld [vmem:[%s2067_s3 + $0x38] sm:$0xff]  ;;  %vm354_vm1 = vcmask 113664   ;;  %v1468_v12 = vld [vmem:[%s2067_s3 + $0x30] sm:$0xff] }
  0x1c   : > { %v1277_v4 = vor.u32 %v1461_v2, %v1276_v1  ;;  %v1467_v13 = vld [vmem:[%s2067_s3 + $0x28] sm:$0xff]  ;;  %v1466_v14 = vld [vmem:[%s2067_s3 + $0x20] sm:$0xff]  ;;  %v1465_v21 = vld [vmem:[%s2067_s3 + $0x18] sm:$0xff]  ;;  %s312_s14 = sand.u32 1, %s1724_s26   ;;  %vm988_vm2 = vcmask 7168   ;;  %s1005_s26 = ssub.s32 (%p1838_p4), 13, %s1868_s24 }
  0x1d   : > { %s321_s25 = scalar_select %p320_p10, %s1868_s24, 12  ;;  %v1464_v22 = vld [vmem:[%s2067_s3 + $0x10] sm:$0xff]  ;;  %v1463_v23 = vld [vmem:[%s2067_s3 + $0x8] sm:$0xff]  ;;  %v1462_v24 = vld [vmem:[%s2067_s3] sm:$0xff] }
  0x1e   : > { %v369_v8 = vsel %vm367_vm0, %v1277_v4, 0  ;;  %v408_v25 = vld [vmem:[#allocation5] sm:$0x1]  ;;  %v1477_v49 = vld [vmem:[%s2067_s3 + $0x78] sm:$0xff]  ;;  %v1476_v52 = vld [vmem:[%s2067_s3 + $0x70] sm:$0xff]  ;;  %s1271_s15 = sshll.u32 %s312_s14, 6 }
  0x1f   : > { %s1273_s28 = sshll.u32 %s321_s25, 3  ;;  %378 = vmatpush.bf16.msra.mxu0 %v369_v8  ;;  %1497 = vmatpush.bf16.msra.mxu1 %v369_v8  ;;  %v410_v27 = vpack.i.b16 %v408_v25, %v408_v25  ;;  %v1475_v56 = vld [vmem:[%s2067_s3 + $0x68] sm:$0xff]  ;;  %v1474_v4 = vld [vmem:[%s2067_s3 + $0x60] sm:$0xff]  ;;  %s1985_s16 = scalar_lea.vmem [#allocation7], %s1271_s15  }
  0x20   : > { %s323_s11 = scalar_lea.vmem %s2064_s0, %s1273_s28  ;;  %650 = vmatpush.bf16.msra.mxu2 %v1477_v49  ;;  %v1470_v8 = vld [vmem:[%s2067_s3 + $0x40] sm:$0xff]  ;;  %s1494_s17 = sshll.u32 (%p1838_p4), %s1826_s6, 6 }
  0x21   : > { %v335_v3 = vld [vmem:[%s323_s11] sm:$0xff]  ;;  %v336_v5 = vld [vmem:[%s323_s11 + $0x8] sm:$0xff]  ;;  %v337_v15 = vld [vmem:[%s323_s11 + $0x10] sm:$0xff]  ;;  %v412_v29 = vperm.slane %v410_v27, 0  ;;  %p1006_p11 = scmp.lt.s32.totalorder (%p1838_p4), %s1005_s26, 8  ;;  %s2010_s20 = scalar_lea.vmem (%p1838_p4), %s2071_s7, %s1494_s17  }
  0x22   : > { %v339_v6 = vld [vmem:[%s323_s11 + $0x20] sm:$0xff]  ;;  %v340_v7 = vld [vmem:[%s323_s11 + $0x28] sm:$0xff]  ;;  %v343_v9 = vpack.c.bf16 %v336_v5, %v335_v3  ;;  %v338_v16 = vld [vmem:[%s323_s11 + $0x18] sm:$0xff] }
  0x23   : > { %v345_v10 = vpack.c.bf16 %v340_v7, %v339_v6  ;;  %498 = vmatpush.bf16.msrb.mxu1 %v1469_v11  ;;  %v341_v17 = vld [vmem:[%s323_s11 + $0x30] sm:$0xff]  ;;  %v342_v18 = vld [vmem:[%s323_s11 + $0x38] sm:$0xff]  ;;  %v344_v19 = vpack.c.bf16 %v338_v16, %v337_v15  ;;  %v421_v32 = vunpack.c.l.bf16 %v412_v29  ;;  %v1471_v7 = vld [vmem:[%s2067_s3 + $0x48] sm:$0xff] }
  0x24   : > { %1278 = vmatmul.msk.bf16.vlgmr.msra.gmra.mxu0 %vm354_vm1, %v343_v9  ;;  %v346_v20 = vpack.c.bf16 %v342_v18, %v341_v17  ;;  %651 = vmatpush.bf16.msra.mxu2 %v1476_v52  ;;  %v1473_v5 = vld [vmem:[%s2067_s3 + $0x58] sm:$0xff]  ;;  %v1472_v6 = vld [vmem:[%s2067_s3 + $0x50] sm:$0xff]  ;;  %v535_v9 = vld [vmem:[%s2068_s4] sm:$0x1] }
  0x25   : > { %1280 = vmatmul.msk.bf16.vlgmr.msra.gmra.mxu1 %vm354_vm1, %v345_v10  ;;  %v537_v10 = vpack.i.b16 %v535_v9, %v535_v9 }
  0x27   : > { %499 = vmatpush.bf16.msrb.mxu1 %v1468_v12 }
  0x28   : > { %652 = vmatpush.bf16.msra.mxu2 %v1475_v56 }
  0x2b   : > { %500 = vmatpush.bf16.msrb.mxu1 %v1467_v13  ;;  %v539_v13 = vperm.slane %v537_v10, 0 }
  0x2c   : > { %653 = vmatpush.bf16.msra.mxu2 %v1474_v4 }
  0x2d   : > { %v548_v15 = vunpack.c.l.bf16 %v539_v13 }
  0x2f   : > { %501 = vmatpush.bf16.msrb.mxu1 %v1466_v14 }
  0x30   : > { %654 = vmatpush.bf16.msra.mxu2 %v1473_v5 }
  0x33   : > { %502 = vmatpush.bf16.msrb.mxu1 %v1465_v21 }
  0x34   : > { %1279 = vmatmul.msk.bf16.gmra.mxu0 %vm354_vm1, %v344_v19  ;;  %655 = vmatpush.bf16.msra.mxu2 %v1472_v6 }
  0x35   : > { %1281 = vmatmul.msk.bf16.gmra.mxu1 %vm354_vm1, %v346_v20 }
  0x37   : > { %503 = vmatpush.bf16.msrb.mxu1 %v1464_v22 }
  0x38   : > { %656 = vmatpush.bf16.msra.mxu2 %v1471_v7 }
  0x3b   : > { %504 = vmatpush.bf16.msrb.mxu1 %v1463_v23 }
  0x3c   : > { %657 = vmatpush.bf16.msra.mxu2 %v1470_v8 }
  0x3f   : > { %505 = vmatpush.bf16.msrb.mxu1 %v1462_v24 }
  0xa1   : > { %v380_v26 = vpop.f32.mrf.mxu0 }
  0xa2   : > { %v400_v28 = vpack.c.bf16 %v380_v26, %v380_v26  ;;  %v390_v39 = vpop.f32.mrf.mxu1 }
  0xa3   : > { %v404_v50 = vpack.c.bf16 %v390_v39, %v390_v39 }
  0xa4   : > { %v413_v31 = vunpack.c.l.bf16 %v400_v28 }
  0xa5   : > { %v417_v54 = vunpack.c.l.bf16 %v404_v50 }
  0xa6   : > { %v422_v35 = vadd.f32 %v421_v32, %v413_v31 }
  0xa7   : > { %v426_v57 = vadd.f32 %v421_v32, %v417_v54 }
  0xa9   : > { %v382_v30 = vpop.f32.mrf.mxu0 }
  0xaa   : > { %v401_v33 = vpack.c.bf16 %v382_v30, %v382_v30  ;;  %v392_v45 = vpop.f32.mrf.mxu1 }
  0xab   : > { %v405_v51 = vpack.c.bf16 %v392_v45, %v392_v45 }
  0xac   : > { %v414_v34 = vunpack.c.l.bf16 %v401_v33 }
  0xad   : > { %v418_v55 = vunpack.c.l.bf16 %v405_v51 }
  0xae   : > { %v423_v36 = vadd.f32 %v421_v32, %v414_v34 }
  0xaf   : > { %v427_v58 = vadd.f32 %v421_v32, %v418_v55 }
  0xb0   : > { %v430_v37 = vpack.c.bf16 %v423_v36, %v422_v35 }
  0xb1   : > { %v385_v38 = vpop.f32.mrf.mxu0  ;;  %v432_v59 = vpack.c.bf16 %v427_v58, %v426_v57 }
  0xb2   : > { %506 = vmatmul.bf16.vlgmr.msrb.gmra.mxu1 %v430_v37  ;;  %v402_v40 = vpack.c.bf16 %v385_v38, %v385_v38  ;;  %v395_v53 = vpop.f32.mrf.mxu1  ;;  %v1485_v37 = vld [vmem:[%s2067_s3 + $0xb8] sm:$0xff]  ;;  %v1484_v38 = vld [vmem:[%s2067_s3 + $0xb0] sm:$0xff] }
  0xb3   : > { %v406_v61 = vpack.c.bf16 %v395_v53, %v395_v53  ;;  %803 = vmatpush.bf16.msra.mxu3 %v1485_v37 }
  0xb4   : > { %v415_v42 = vunpack.c.l.bf16 %v402_v40 }
  0xb5   : > { %v419_v63 = vunpack.c.l.bf16 %v406_v61  ;;  %v1481_v61 = vld [vmem:[%s2067_s3 + $0x98] sm:$0xff] }
  0xb6   : > { %v424_v46 = vadd.f32 %v421_v32, %v415_v42  ;;  %v1483_v42 = vld [vmem:[%s2067_s3 + $0xa8] sm:$0xff] }
  0xb7   : > { %v428_v1 = vadd.f32 %v421_v32, %v419_v63  ;;  %804 = vmatpush.bf16.msra.mxu3 %v1484_v38  ;;  %v1479_v63 = vld [vmem:[%s2067_s3 + $0x88] sm:$0xff]  ;;  %v1490_v38 = vld [vmem:[%s2069_s5 + $0x20] sm:$0xff] }
  0xb9   : > { %v387_v41 = vpop.f32.mrf.mxu0 }
  0xba   : > { %v403_v43 = vpack.c.bf16 %v387_v41, %v387_v41  ;;  %v397_v60 = vpop.f32.mrf.mxu1 }
  0xbb   : > { %v407_v62 = vpack.c.bf16 %v397_v60, %v397_v60  ;;  %805 = vmatpush.bf16.msra.mxu3 %v1483_v42  ;;  %v1482_v60 = vld [vmem:[%s2067_s3 + $0xa0] sm:$0xff] }
  0xbc   : > { %v416_v44 = vunpack.c.l.bf16 %v403_v43 }
  0xbd   : > { %v420_v0 = vunpack.c.l.bf16 %v407_v62  ;;  %v1480_v62 = vld [vmem:[%s2067_s3 + $0x90] sm:$0xff] }
  0xbe   : > { %v425_v47 = vadd.f32 %v421_v32, %v416_v44 }
  0xbf   : > { %v429_v2 = vadd.f32 %v421_v32, %v420_v0  ;;  %806 = vmatpush.bf16.msra.mxu3 %v1482_v60  ;;  %v1478_v0 = vld [vmem:[%s2067_s3 + $0x80] sm:$0xff] }
  0xc0   : > { %v431_v48 = vpack.c.bf16 %v425_v47, %v424_v46 }
  0xc1   : > { %v433_v3 = vpack.c.bf16 %v429_v2, %v428_v1  ;;  %v1362_v1 = vld [vmem:[%s2068_s4 + $0x1] sm:$0x1] }
  0xc2   : > { %511 = vmatmul.bf16.gmra.mxu1 %v431_v48  ;;  %v690_v2 = vpack.i.b16 %v1362_v1, %v1362_v1 }
  0xc3   : > { %807 = vmatpush.bf16.msra.mxu3 %v1481_v61 }
  0xc4   : > { %v692_v5 = vperm.slane %v690_v2, 0 }
  0xc6   : > { %v701_v7 = vunpack.c.l.bf16 %v692_v5 }
  0xc7   : > { %808 = vmatpush.bf16.msra.mxu3 %v1480_v62 }
  0xcb   : > { %809 = vmatpush.bf16.msra.mxu3 %v1479_v63 }
  0xcf   : > { %810 = vmatpush.bf16.msra.mxu3 %v1478_v0 }
  0xd2   : > { %516 = vmatmul.bf16.gmra.mxu1 %v432_v59 }
  0xe2   : > { %521 = vmatmul.bf16.gmra.mxu1 %v433_v3 }
 0x12f   : > { %v507_v11 = vpop.f32.mrf.mxu1 }
 0x130   : > { %v527_v12 = vpack.c.bf16 %v507_v11, %v507_v11 }
 0x132   : > { %v540_v14 = vunpack.c.l.bf16 %v527_v12 }
 0x134   : > { %v549_v18 = vadd.f32 %v548_v15, %v540_v14 }
 0x136   : > { %v573_v21 = vmax.f32 %v549_v18, 0.0 }
 0x137   : > { %v509_v16 = vpop.f32.mrf.mxu1 }
 0x138   : > { %v528_v17 = vpack.c.bf16 %v509_v16, %v509_v16 }
 0x13a   : > { %v541_v19 = vunpack.c.l.bf16 %v528_v17 }
 0x13c   : > { %v550_v20 = vadd.f32 %v548_v15, %v541_v19 }
 0x13e   : > { %v574_v22 = vmax.f32 %v550_v20, 0.0 }
 0x13f   : > { %v512_v23 = vpop.f32.mrf.mxu1 }
 0x140   : > { %v581_v24 = vpack.c.bf16 %v574_v22, %v573_v21  ;;  %v529_v25 = vpack.c.bf16 %v512_v23, %v512_v23 }
 0x142   : > { %658 = vmatmul.bf16.vlgmr.msra.gmra.mxu2 %v581_v24  ;;  %v542_v26 = vunpack.c.l.bf16 %v529_v25 }
 0x144   : > { %v551_v29 = vadd.f32 %v548_v15, %v542_v26 }
 0x146   : > { %v575_v32 = vmax.f32 %v551_v29, 0.0  ;;  %v1493_v29 = vld [vmem:[%s2069_s5 + $0x38] sm:$0xff] }
 0x147   : > { %v514_v27 = vpop.f32.mrf.mxu1  ;;  %959 = vmatpush.bf16.msrb.mxu0 %v1493_v29 }
 0x148   : > { %v530_v28 = vpack.c.bf16 %v514_v27, %v514_v27 }
 0x14a   : > { %v543_v30 = vunpack.c.l.bf16 %v530_v28 }
 0x14c   : > { %v552_v31 = vadd.f32 %v548_v15, %v543_v30  ;;  %v1492_v30 = vld [vmem:[%s2069_s5 + $0x30] sm:$0xff] }
 0x14d   : > { %960 = vmatpush.bf16.msrb.mxu0 %v1492_v30 }
 0x14e   : > { %v576_v33 = vmax.f32 %v552_v31, 0.0 }
 0x14f   : > { %v517_v34 = vpop.f32.mrf.mxu1 }
 0x150   : > { %v582_v35 = vpack.c.bf16 %v576_v33, %v575_v32  ;;  %v531_v36 = vpack.c.bf16 %v517_v34, %v517_v34  ;;  %v1491_v34 = vld [vmem:[%s2069_s5 + $0x28] sm:$0xff] }
 0x151   : > { %961 = vmatpush.bf16.msrb.mxu0 %v1491_v34 }
 0x152   : > { %663 = vmatmul.bf16.gmra.mxu2 %v582_v35  ;;  %v544_v39 = vunpack.c.l.bf16 %v531_v36 }
 0x154   : > { %v553_v43 = vadd.f32 %v548_v15, %v544_v39 }
 0x155   : > { %962 = vmatpush.bf16.msrb.mxu0 %v1490_v38 }
 0x156   : > { %v577_v46 = vmax.f32 %v553_v43, 0.0 }
 0x157   : > { %v519_v40 = vpop.f32.mrf.mxu1 }
 0x158   : > { %v532_v41 = vpack.c.bf16 %v519_v40, %v519_v40 }
 0x15a   : > { %v545_v44 = vunpack.c.l.bf16 %v532_v41 }
 0x15c   : > { %v554_v45 = vadd.f32 %v548_v15, %v545_v44 }
 0x15e   : > { %v578_v47 = vmax.f32 %v554_v45, 0.0 }
 0x15f   : > { %v522_v48 = vpop.f32.mrf.mxu1 }
 0x160   : > { %v583_v49 = vpack.c.bf16 %v578_v47, %v577_v46  ;;  %v533_v50 = vpack.c.bf16 %v522_v48, %v522_v48 }
 0x162   : > { %668 = vmatmul.bf16.gmra.mxu2 %v583_v49  ;;  %v546_v51 = vunpack.c.l.bf16 %v533_v50 }
 0x164   : > { %v555_v54 = vadd.f32 %v548_v15, %v546_v51 }
 0x166   : > { %v579_v58 = vmax.f32 %v555_v54, 0.0  ;;  %v1488_v54 = vld [vmem:[%s2069_s5 + $0x10] sm:$0xff] }
 0x167   : > { %v524_v52 = vpop.f32.mrf.mxu1 }
 0x168   : > { %v534_v53 = vpack.c.bf16 %v524_v52, %v524_v52 }
 0x16a   : > { %v547_v55 = vunpack.c.l.bf16 %v534_v53  ;;  %v1489_v53 = vld [vmem:[%s2069_s5 + $0x18] sm:$0xff] }
 0x16b   : > { %963 = vmatpush.bf16.msrb.mxu0 %v1489_v53 }
 0x16c   : > { %v556_v56 = vadd.f32 %v548_v15, %v547_v55  ;;  %v1487_v55 = vld [vmem:[%s2069_s5 + $0x8] sm:$0xff] }
 0x16e   : > { %v580_v57 = vmax.f32 %v556_v56, 0.0  ;;  %v1486_v56 = vld [vmem:[%s2069_s5] sm:$0xff] }
 0x16f   : > { %964 = vmatpush.bf16.msrb.mxu0 %v1488_v54 }
 0x170   : > { %v584_v59 = vpack.c.bf16 %v580_v57, %v579_v58  ;;  %v1411_v57 = vld [vmem:[%s2068_s4 + $0x2] sm:$0x1] }
 0x171   : > { %v843_v58 = vpack.i.b16 %v1411_v57, %v1411_v57 }
 0x172   : > { %673 = vmatmul.bf16.gmra.mxu2 %v584_v59 }
 0x173   : > { %965 = vmatpush.bf16.msrb.mxu0 %v1487_v55  ;;  %v845_v61 = vperm.slane %v843_v58, 0 }
 0x175   : > { %v854_v63 = vunpack.c.l.bf16 %v845_v61 }
 0x177   : > { %966 = vmatpush.bf16.msrb.mxu0 %v1486_v56 }
 0x1c5   : > { %v659_v3 = vpop.f32.mrf.mxu2 }
 0x1c6   : > { %v679_v4 = vpack.c.bf16 %v659_v3, %v659_v3 }
 0x1c8   : > { %v693_v6 = vunpack.c.l.bf16 %v679_v4 }
 0x1ca   : > { %v702_v10 = vadd.f32 %v701_v7, %v693_v6 }
 0x1cc   : > { %v726_v13 = vmax.f32 %v702_v10, 0.0 }
 0x1cd   : > { %v661_v8 = vpop.f32.mrf.mxu2 }
 0x1ce   : > { %v680_v9 = vpack.c.bf16 %v661_v8, %v661_v8 }
 0x1d0   : > { %v694_v11 = vunpack.c.l.bf16 %v680_v9 }
 0x1d2   : > { %v703_v12 = vadd.f32 %v701_v7, %v694_v11 }
 0x1d4   : > { %v727_v14 = vmax.f32 %v703_v12, 0.0 }
 0x1d5   : > { %v664_v15 = vpop.f32.mrf.mxu2 }
 0x1d6   : > { %v734_v16 = vpack.c.bf16 %v727_v14, %v726_v13  ;;  %v681_v17 = vpack.c.bf16 %v664_v15, %v664_v15 }
 0x1d8   : > { %811 = vmatmul.bf16.vlgmr.msra.gmra.mxu3 %v734_v16  ;;  %v695_v18 = vunpack.c.l.bf16 %v681_v17 }
 0x1da   : > { %v704_v21 = vadd.f32 %v701_v7, %v695_v18 }
 0x1dc   : > { %v728_v24 = vmax.f32 %v704_v21, 0.0 }
 0x1dd   : > { %v666_v19 = vpop.f32.mrf.mxu2 }
 0x1de   : > { %v682_v20 = vpack.c.bf16 %v666_v19, %v666_v19 }
 0x1e0   : > { %v696_v22 = vunpack.c.l.bf16 %v682_v20 }
 0x1e2   : > { %v705_v23 = vadd.f32 %v701_v7, %v696_v22 }
 0x1e4   : > { %v729_v25 = vmax.f32 %v705_v23, 0.0 }
 0x1e5   : > { %v669_v26 = vpop.f32.mrf.mxu2 }
 0x1e6   : > { %v735_v27 = vpack.c.bf16 %v729_v25, %v728_v24  ;;  %v683_v28 = vpack.c.bf16 %v669_v26, %v669_v26 }
 0x1e8   : > { %816 = vmatmul.bf16.gmra.mxu3 %v735_v27  ;;  %v697_v31 = vunpack.c.l.bf16 %v683_v28 }
 0x1ea   : > { %v706_v35 = vadd.f32 %v701_v7, %v697_v31 }
 0x1ec   : > { %v730_v39 = vmax.f32 %v706_v35, 0.0 }
 0x1ed   : > { %v671_v32 = vpop.f32.mrf.mxu2 }
 0x1ee   : > { %v684_v33 = vpack.c.bf16 %v671_v32, %v671_v32 }
 0x1f0   : > { %v698_v36 = vunpack.c.l.bf16 %v684_v33 }
 0x1f2   : > { %v707_v37 = vadd.f32 %v701_v7, %v698_v36 }
 0x1f4   : > { %v731_v40 = vmax.f32 %v707_v37, 0.0 }
 0x1f5   : > { %v674_v41 = vpop.f32.mrf.mxu2 }
 0x1f6   : > { %v736_v42 = vpack.c.bf16 %v731_v40, %v730_v39  ;;  %v685_v43 = vpack.c.bf16 %v674_v41, %v674_v41  ;;  %v1609_v41 = vld [vmem:[#allocation2] ss:$0 sm:$0xff] }
 0x1f8   : > { %821 = vmatmul.bf16.gmra.mxu3 %v736_v42  ;;  %v699_v44 = vunpack.c.l.bf16 %v685_v43 }
 0x1fa   : > { %v708_v47 = vadd.f32 %v701_v7, %v699_v44 }
 0x1fc   : > { %v732_v51 = vmax.f32 %v708_v47, 0.0 }
 0x1fd   : > { %v676_v45 = vpop.f32.mrf.mxu2 }
 0x1fe   : > { %v686_v46 = vpack.c.bf16 %v676_v45, %v676_v45 }
 0x200   : > { %v700_v48 = vunpack.c.l.bf16 %v686_v46 }
 0x202   : > { %v709_v49 = vadd.f32 %v701_v7, %v700_v48 }
 0x204   : > { %v733_v50 = vmax.f32 %v709_v49, 0.0 }
 0x206   : > { %v737_v52 = vpack.c.bf16 %v733_v50, %v732_v51 }
 0x208   : > { %826 = vmatmul.bf16.gmra.mxu3 %v737_v52 }
 0x25b   : > { %v812_v59 = vpop.f32.mrf.mxu3 }
 0x25c   : > { %v832_v60 = vpack.c.bf16 %v812_v59, %v812_v59 }
 0x25e   : > { %v846_v62 = vunpack.c.l.bf16 %v832_v60 }
 0x260   : > { %v855_v2 = vadd.f32 %v854_v63, %v846_v62 }
 0x262   : > { %v879_v5 = vmax.f32 %v855_v2, 0.0 }
 0x263   : > { %v814_v0 = vpop.f32.mrf.mxu3 }
 0x264   : > { %v833_v1 = vpack.c.bf16 %v814_v0, %v814_v0 }
 0x266   : > { %v847_v3 = vunpack.c.l.bf16 %v833_v1 }
 0x268   : > { %v856_v4 = vadd.f32 %v854_v63, %v847_v3 }
 0x26a   : > { %v880_v6 = vmax.f32 %v856_v4, 0.0 }
 0x26b   : > { %v817_v7 = vpop.f32.mrf.mxu3 }
 0x26c   : > { %v887_v8 = vpack.c.bf16 %v880_v6, %v879_v5  ;;  %v834_v9 = vpack.c.bf16 %v817_v7, %v817_v7 }
 0x26e   : > { %967 = vmatmul.bf16.vlgmr.msrb.gmra.mxu0 %v887_v8  ;;  %v848_v10 = vunpack.c.l.bf16 %v834_v9 }
 0x270   : > { %v857_v13 = vadd.f32 %v854_v63, %v848_v10 }
 0x272   : > { %v881_v16 = vmax.f32 %v857_v13, 0.0 }
 0x273   : > { %v819_v11 = vpop.f32.mrf.mxu3 }
 0x274   : > { %v835_v12 = vpack.c.bf16 %v819_v11, %v819_v11 }
 0x276   : > { %v849_v14 = vunpack.c.l.bf16 %v835_v12 }
 0x278   : > { %v858_v15 = vadd.f32 %v854_v63, %v849_v14 }
 0x27a   : > { %v882_v17 = vmax.f32 %v858_v15, 0.0 }
 0x27b   : > { %v822_v18 = vpop.f32.mrf.mxu3 }
 0x27c   : > { %v888_v19 = vpack.c.bf16 %v882_v17, %v881_v16  ;;  %v836_v20 = vpack.c.bf16 %v822_v18, %v822_v18 }
 0x27e   : > { %972 = vmatmul.bf16.gmra.mxu0 %v888_v19  ;;  %v850_v21 = vunpack.c.l.bf16 %v836_v20 }
 0x280   : > { %v859_v24 = vadd.f32 %v854_v63, %v850_v21 }
 0x282   : > { %v883_v27 = vmax.f32 %v859_v24, 0.0 }
 0x283   : > { %v824_v22 = vpop.f32.mrf.mxu3 }
 0x284   : > { %v837_v23 = vpack.c.bf16 %v824_v22, %v824_v22 }
 0x286   : > { %v851_v25 = vunpack.c.l.bf16 %v837_v23 }
 0x288   : > { %v860_v26 = vadd.f32 %v854_v63, %v851_v25 }
 0x28a   : > { %v884_v28 = vmax.f32 %v860_v26, 0.0 }
 0x28b   : > { %v827_v29 = vpop.f32.mrf.mxu3 }
 0x28c   : > { %v889_v30 = vpack.c.bf16 %v884_v28, %v883_v27  ;;  %v838_v31 = vpack.c.bf16 %v827_v29, %v827_v29 }
 0x28e   : > { %977 = vmatmul.bf16.gmra.mxu0 %v889_v30  ;;  %v852_v32 = vunpack.c.l.bf16 %v838_v31 }
 0x290   : > { %v861_v35 = vadd.f32 %v854_v63, %v852_v32 }
 0x292   : > { %v885_v39 = vmax.f32 %v861_v35, 0.0 }
 0x293   : > { %v829_v33 = vpop.f32.mrf.mxu3 }
 0x294   : > { %v839_v34 = vpack.c.bf16 %v829_v33, %v829_v33 }
 0x296   : > { %v853_v36 = vunpack.c.l.bf16 %v839_v34 }
 0x298   : > { %v862_v37 = vadd.f32 %v854_v63, %v853_v36 }
 0x29a   : > { %v886_v38 = vmax.f32 %v862_v37, 0.0 }
 0x29c   : > { %v890_v40 = vpack.c.bf16 %v886_v38, %v885_v39 }
 0x29e   : > { %982 = vmatmul.bf16.gmra.mxu0 %v890_v40 }
 0x2eb   : > { %v968_v42 = vpop.f32.mrf.mxu0 }
 0x2ec   : > { %v969_v43 = vadd.f32 %v1609_v41, %v968_v42 }
 0x2ee   : > { %989 = vst.msk [vmem:[%s1985_s16] sm:$0xff] %vm988_vm2, %v969_v43 }
 0x2f3   : > { %v970_v44 = vpop.f32.mrf.mxu0 }
 0x2f4   : > { %v971_v45 = vadd.f32 %v1609_v41, %v970_v44 }
 0x2f6   : > { %990 = vst.msk [vmem:[%s1985_s16 + $0x8] sm:$0xff] %vm988_vm2, %v971_v45 }
 0x2fb   : > { %v973_v46 = vpop.f32.mrf.mxu0 }
 0x2fc   : > { %v974_v47 = vadd.f32 %v1609_v41, %v973_v46 }
 0x2fe   : > { %991 = vst.msk [vmem:[%s1985_s16 + $0x10] sm:$0xff] %vm988_vm2, %v974_v47 }
 0x303   : > { %v975_v48 = vpop.f32.mrf.mxu0 }
 0x304   : > { %v976_v49 = vadd.f32 %v1609_v41, %v975_v48 }
 0x306   : > { %992 = vst.msk [vmem:[%s1985_s16 + $0x18] sm:$0xff] %vm988_vm2, %v976_v49 }
 0x30b   : > { %v978_v50 = vpop.f32.mrf.mxu0 }
 0x30c   : > { %v979_v51 = vadd.f32 %v1609_v41, %v978_v50 }
 0x30e   : > { %993 = vst.msk [vmem:[%s1985_s16 + $0x20] sm:$0xff] %vm988_vm2, %v979_v51 }
 0x313   : > { %v980_v52 = vpop.f32.mrf.mxu0 }
 0x314   : > { %v981_v53 = vadd.f32 %v1609_v41, %v980_v52 }
 0x316   : > { %994 = vst.msk [vmem:[%s1985_s16 + $0x28] sm:$0xff] %vm988_vm2, %v981_v53 }
 0x31b   : > { %v983_v54 = vpop.f32.mrf.mxu0 }
 0x31c   : > { %v984_v55 = vadd.f32 %v1609_v41, %v983_v54 }
 0x31e   : > { %995 = vst.msk [vmem:[%s1985_s16 + $0x30] sm:$0xff] %vm988_vm2, %v984_v55 }
 0x322   : > { %1003 = sbr.rel (!%p1838_p4) target bundleno = 849 (0x351), region = 60 }
 0x323   : > { %v985_v56 = vpop.f32.mrf.mxu0 }
 0x324   : > { %v986_v57 = vadd.f32 %v1609_v41, %v985_v56 }
 0x326   : > { %996 = vst.msk [vmem:[%s1985_s16 + $0x38] sm:$0xff] %vm988_vm2, %v986_v57 }
 0x327   : > { %s2082_s26 = smov (!%p1006_p11, %s1005_s26), 8 }
 0x328   : > { %s1446_s21 = sshll.u32 %s2082_s26, 3 }
 0x329   : > { %p1449_p12 = scmp.eq.s32.totalorder %s1446_s21, 0 }
 0x32a   : > { %s2016_s22 = sshrl.u32 (!%p1449_p12), %s2082_s26, 3 }
 0x32b   : > { %1014 = sbr.rel (%p1449_p12) target bundleno = 849 (0x351), region = 64  ;;  %p1450_p13 = scmp.le.s32.totalorder (!%p1449_p12), %s2016_s22, 0 }
 0x330   : > { %1201 = sbr.rel (%p1450_p13) target bundleno = 832 (0x340), region = 145  ;;  %s2074_s6 = smov (!%p1450_p13), %s2010_s20 }
 0x331   : > { %s2075_s10 = smov (!%p1450_p13), %s1985_s16  ;;  %s2025_s24 = smov (!%p1450_p13), 0  }
 0x332   : > { %s2027_s23 = smov (!%p1450_p13), 0  }
 0x335 LB: >> { %v1091_v58 = vld [vmem:[%s1740_s10] sm:$0xff]  ;;  %v1093_v59 = vld [vmem:[%s1740_s10 + $0x8] sm:$0xff]  ;;  %v1095_v60 = vld [vmem:[%s1740_s10 + $0x10] sm:$0xff]  ;;  %s1107_s25 = sadd.s32 1, %s1744_s24  ;;  %s1085_s23 = sadd.s32 1, %s1748_s23   ;;  %s1748_s23 = sphi %s2027_s23, %s1085_s23   ;;  %s1744_s24 = sphi %s2025_s24, %s2077_s24   ;;  %s1740_s10 = sphi %s2075_s10, %s1112_s10   ;;  %s1736_s6 = sphi %s2074_s6, %s2076_s6  }
 0x336   : >> { %1092 = vst [vmem:[%s1736_s6] sm:$0xff] %v1091_v58  ;;  %v1097_v61 = vld [vmem:[%s1740_s10 + $0x18] sm:$0xff]  ;;  %p1108_p0 = scmp.ge.s32.totalorder %s1107_s25, %s2016_s22  ;;  %v1099_v62 = vld [vmem:[%s1740_s10 + $0x20] sm:$0xff]  ;;  %v1101_v63 = vld [vmem:[%s1740_s10 + $0x28] sm:$0xff]  ;;  %p1084_p1 = scmp.ge.s32.totalorder %s1085_s23, %s2016_s22 }
 0x337   : >> { %1094 = vst [vmem:[%s1736_s6 + $0x8] sm:$0xff] %v1093_v59  ;;  %v1103_v0 = vld [vmem:[%s1740_s10 + $0x30] sm:$0xff]  ;;  %v1105_v1 = vld [vmem:[%s1740_s10 + $0x38] sm:$0xff] }
 0x338   : >> { %1096 = vst [vmem:[%s1736_s6 + $0x10] sm:$0xff] %v1095_v60  ;;  %s2084_s25 = smov (%p1108_p0, %s1107_s25), 0 }
 0x339   : >> { %1098 = vst [vmem:[%s1736_s6 + $0x18] sm:$0xff] %v1097_v61  ;;  %s1451_s28 = sshll.u32 %s2084_s25, 6  ;;  %s2077_s24 = smov %s2084_s25 }
 0x33a   : >> { %1100 = vst [vmem:[%s1736_s6 + $0x20] sm:$0xff] %v1099_v62  ;;  %s1112_s10 = scalar_lea.vmem %s1985_s16, %s1451_s28 [#allocation7]   ;;  %s1113_s30 = scalar_lea.vmem %s2010_s20, %s1451_s28  }
 0x33b   : >> { %1102 = vst [vmem:[%s1736_s6 + $0x28] sm:$0xff] %v1101_v63  ;;  %1087 = sbr.rel (!%p1084_p1) target bundleno = 821 (0x335), region = 151 }
 0x33c   : >> { %1104 = vst [vmem:[%s1736_s6 + $0x30] sm:$0xff] %v1103_v0 }
 0x33d   : >> { %1106 = vst [vmem:[%s1736_s6 + $0x38] sm:$0xff] %v1105_v1  ;;  %s2076_s6 = smov %s1113_s30 }
 0x340 PF: > { %s2046_s8 = sand.u32 7, %s2082_s26   ;;  %s1495_s11 = sshll.u32 %s2016_s22, 6 }
 0x341   : > { %s1118_s12 = scalar_lea.vmem %s1985_s16, %s1495_s11 [#allocation7]   ;;  %s1120_s13 = scalar_lea.vmem %s2010_s20, %s1495_s11  }
 0x342   : > { %p1456_p2 = scmp.le.s32.totalorder %s2046_s8, 0 }
 0x343   : > { %s1750_s14 = smov (!%p1456_p2), %s1120_s13   ;;  %s1754_s15 = smov (!%p1456_p2), %s1118_s12  }
 0x344   : > { %1215 = sbr.rel (%p1456_p2) target bundleno = 849 (0x351), region = 156  ;;  %s1758_s17 = smov (!%p1456_p2), 0  }
 0x345   : > { %s1762_s18 = smov (!%p1456_p2), 0  }
 0x349 LB: >> { %v1130_v2 = vld [vmem:[%s1756_s15] sm:$0xff]  ;;  %s1132_s26 = sadd.s32 1, %s1760_s17  ;;  %s1124_s18 = sadd.s32 1, %s1764_s18   ;;  %s1764_s18 = sphi %s1762_s18, %s1124_s18   ;;  %s1760_s17 = sphi %s1758_s17, %s1759_s17   ;;  %s1756_s15 = sphi %s1754_s15, %s1137_s15   ;;  %s1752_s14 = sphi %s1750_s14, %s1138_s14  }
 0x34a   : >> { %1131 = vst [vmem:[%s1752_s14] sm:$0xff] %v1130_v2  ;;  %p1133_p3 = scmp.ge.s32.totalorder %s1132_s26, %s2046_s8  ;;  %p1123_p4 = scmp.ge.s32.totalorder %s1124_s18, %s2046_s8 }
 0x34c   : >> { %s2086_s26 = smov (%p1133_p3, %s1132_s26), 0  ;;  %1126 = sbr.rel (!%p1123_p4) target bundleno = 841 (0x349), region = 162 }
 0x34d   : >> { %s1457_s16 = sshll.u32 %s2086_s26, 3  ;;  %s1759_s17 = smov %s2086_s26  }
 0x34e   : >> { %s1137_s15 = scalar_lea.vmem %s1118_s12, %s1457_s16 [#allocation7]   ;;  %s1138_s14 = scalar_lea.vmem %s1120_s13, %s1457_s16  }
 0x351 PF: > { %p18_p5 = scmp.ge.s32.totalorder %s1828_s29, 4   ;;  %s2078_s26 = smov %s1728_s27 }
 0x352   : > { %s2079_s27 = smov %s1836_s9  ;;  %s2080_s28 = smov %s1828_s29 }
 0x353   :  { %20 = sbr.rel (!%p18_p5) target bundleno = 6 (0x6), region = 173 }
 0x358   :  { %1154 = vsyncpa [#allocation4], 1 }
 0x359   :  { %1156 = vsyncpa [#allocation4 + $0x1], 1 }
 0x35a   :  { %1157 = vsyncpa [#allocation6], 1 }

</bundles_post_ra>
